<compile_context>
chip_gen: v7x
topology: tpu7x:2x2x1
jax: 0.10.0
libtpu: 0.0.40
codegen_flags: <defaults>
</compile_context>

<pallas_src>
import jax
import jax.numpy as jnp
import numpy as np
from jax.experimental import pallas as pl
from jax.experimental.pallas import tpu as pltpu


def _round_up(v: int, m: int) -> int:
    return ((v + m - 1) // m) * m


def _linear_kernel(x_ref, w_ref, b_ref, o_ref, acc_ref):
    k = pl.program_id(2)

    @pl.when(k == 0)
    def _():
        acc_ref[...] = jnp.zeros_like(acc_ref)

    # MXU matmul with f32 accumulation.
    acc_ref[...] += jnp.dot(
        x_ref[...], w_ref[...], preferred_element_type=jnp.float32
    )

    @pl.when(k == pl.num_programs(2) - 1)
    def _():
        # Bias broadcast-add once per output tile, then cast to output dtype.
        o_ref[...] = (acc_ref[...] + b_ref[...]).astype(o_ref.dtype)


def _tiled_linear(x, W, b2d, tm, tn, tk):
    M, K = x.shape
    _, N = W.shape
    grid = (M // tm, N // tn, K // tk)

    return pl.pallas_call(
        _linear_kernel,
        out_shape=jax.ShapeDtypeStruct((M, N), jnp.float32),
        grid=grid,
        in_specs=[
            pl.BlockSpec((tm, tk), lambda i, j, k: (i, k)),
            pl.BlockSpec((tk, tn), lambda i, j, k: (k, j)),
            pl.BlockSpec((1, tn), lambda i, j, k: (0, j)),
        ],
        out_specs=pl.BlockSpec((tm, tn), lambda i, j, k: (i, j)),
        scratch_shapes=[pltpu.VMEM((tm, tn), jnp.float32)],
        compiler_params=pltpu.CompilerParams(
            dimension_semantics=("parallel", "parallel", "arbitrary"),
        ),
    )(x, W, b2d)


@jax.jit
def linear_forward(x, W, b):
    """y = x @ W + b, matching the numpy reference semantics.

    A 1-D input of length in_features is reshaped to (1, in_features); the
    result then has shape (1, out_features), exactly like the reference.
    """
    if x.ndim < 2:
        x = x.reshape(1, -1)

    M, K = x.shape
    Kw, N = W.shape
    assert K == Kw, "in_features mismatch between x and W"

    # Tile sizes: MXU / lane aligned, clamped for small problems.
    tm = 256 if M >= 256 else _round_up(M, 8)
    tn = 256 if N >= 256 else _round_up(N, 128)
    tk = 512 if K >= 512 else _round_up(K, 128)

    Mp = _round_up(M, tm)
    Kp = _round_up(K, tk)
    Np = _round_up(N, tn)

    x_p = x.astype(jnp.float32)
    W_p = W.astype(jnp.float32)
    b2d = b.reshape(1, -1).astype(jnp.float32)

    if (Mp, Kp) != (M, K):
        x_p = jnp.pad(x_p, ((0, Mp - M), (0, Kp - K)))
    if (Kp, Np) != (K, N):
        W_p = jnp.pad(W_p, ((0, Kp - K), (0, Np - N)))
    if Np != N:
        b2d = jnp.pad(b2d, ((0, 0), (0, Np - N)))

    out = _tiled_linear(x_p, W_p, b2d, tm, tn, tk)
    return out[:M, :N]


if __name__ == "__main__":
    # Deterministic parameter init mirroring Linear.__init__:
    # W ~ N(0, 2/sqrt(in+out)) of shape (in_features, out_features)
    # b ~ N(0, 2/sqrt(in+out)) of shape (out_features,)
    in_features, out_features = 32, 16
    batch = 8

    key = jax.random.PRNGKey(0)
    kx, kw, kb = jax.random.split(key, 3)

    std = 2.0 / np.sqrt(in_features + out_features)
    W = jax.random.normal(kw, (in_features, out_features), dtype=jnp.float32) * std
    b = jax.random.normal(kb, (out_features,), dtype=jnp.float32) * std
    x = jax.random.normal(kx, (batch, in_features), dtype=jnp.float32)

    y = linear_forward(x, W, b)
    y = jax.block_until_ready(y)

    # Reference check against plain JAX (same math as numpy x @ W + b).
    y_ref = x @ W + b
    np.testing.assert_allclose(np.asarray(y), np.asarray(y_ref), rtol=1e-5, atol=1e-5)

    # 1-D input path (reference reshapes to (1, in_features)).
    xv = jax.random.normal(jax.random.PRNGKey(1), (in_features,), dtype=jnp.float32)
    yv = jax.block_until_ready(linear_forward(xv, W, b))
    np.testing.assert_allclose(
        np.asarray(yv), np.asarray(xv.reshape(1, -1) @ W + b), rtol=1e-5, atol=1e-5
    )

    # A larger, tile-exercising shape to hit the real M/N/K grid path.
    M2, K2, N2 = 512, 1024, 384
    x2 = jax.random.normal(jax.random.PRNGKey(2), (M2, K2), dtype=jnp.float32)
    W2 = jax.random.normal(jax.random.PRNGKey(3), (K2, N2), dtype=jnp.float32) * 0.02
    b2 = jax.random.normal(jax.random.PRNGKey(4), (N2,), dtype=jnp.float32) * 0.02
    y2 = jax.block_until_ready(linear_forward(x2, W2, b2))
    np.testing.assert_allclose(
        np.asarray(y2), np.asarray(x2 @ W2 + b2), rtol=5e-4, atol=5e-4
    )

    print("KERNEL_OK")
</pallas_src>

<mosaic_0001>
module attributes {stable_mosaic.version = 11 : i64} {
  func.func @_linear_kernel(%arg0: i32, %arg1: i32, %arg2: i32, %arg3: memref<8x128xf32, #tpu.memory_space<vmem>>, %arg4: memref<128x128xf32, #tpu.memory_space<vmem>>, %arg5: memref<1x128xf32, #tpu.memory_space<vmem>>, %arg6: memref<8x128xf32, #tpu.memory_space<vmem>>, %arg7: memref<8x128xf32, #tpu.memory_space<vmem>>) attributes {dimension_semantics = [#tpu.dimension_semantics<parallel>, #tpu.dimension_semantics<parallel>, #tpu.dimension_semantics<arbitrary>], iteration_bounds = array<i64: 1, 1, 1>, scalar_prefetch = 0 : i64, scratch_operands = 1 : i64, tpu.core_type = #tpu.core_type<tc>, window_params = [{transform_indices = @transform_0, window_bounds = array<i64: 8, 128>}, {transform_indices = @transform_1, window_bounds = array<i64: 128, 128>}, {transform_indices = @transform_2, window_bounds = array<i64: 1, 128>}, {transform_indices = @transform_3, window_bounds = array<i64: 8, 128>}]} {
    %c0_i32 = arith.constant 0 : i32
    %0 = arith.cmpi eq, %arg2, %c0_i32 : i32
    %1 = arith.extui %0 : i1 to i32
    %c0_i32_0 = arith.constant 0 : i32
    %2 = arith.cmpi ne, %1, %c0_i32_0 : i32
    scf.if %2 {
      %cst_10 = arith.constant 0.000000e+00 : f32
      %12 = vector.broadcast %cst_10 : f32 to vector<8x128xf32>
      %c0_11 = arith.constant 0 : index
      %c0_12 = arith.constant 0 : index
      %13 = vector.load %arg7[%c0_11, %c0_12] : memref<8x128xf32, #tpu.memory_space<vmem>>, vector<8x128xf32>
      tpu.vector_store %arg7[%c0_11, %c0_12], %12 {strides = array<i32>} : memref<8x128xf32, #tpu.memory_space<vmem>>, vector<8x128xf32>,
    } else {
    }
    %c0 = arith.constant 0 : index
    %c0_1 = arith.constant 0 : index
    %3 = vector.load %arg7[%c0, %c0_1] : memref<8x128xf32, #tpu.memory_space<vmem>>, vector<8x128xf32>
    %c0_2 = arith.constant 0 : index
    %c0_3 = arith.constant 0 : index
    %4 = vector.load %arg3[%c0_2, %c0_3] : memref<8x128xf32, #tpu.memory_space<vmem>>, vector<8x128xf32>
    %c0_4 = arith.constant 0 : index
    %c0_5 = arith.constant 0 : index
    %5 = vector.load %arg4[%c0_4, %c0_5] : memref<128x128xf32, #tpu.memory_space<vmem>>, vector<128x128xf32>
    %cst = arith.constant dense<0.000000e+00> : vector<8x128xf32>
    %6 = tpu.matmul %4, %5, %cst {dimension_numbers = #tpu.dot_dimension_numbers<[1], [0], [0], [1], [0, 0, 1, 1], [], []>} : vector<8x128xf32>, vector<128x128xf32>, vector<8x128xf32> -> vector<8x128xf32>
    %7 = arith.addf %3, %6 : vector<8x128xf32>
    %c0_6 = arith.constant 0 : index
    %c0_7 = arith.constant 0 : index
    %8 = vector.load %arg7[%c0_6, %c0_7] : memref<8x128xf32, #tpu.memory_space<vmem>>, vector<8x128xf32>
    tpu.vector_store %arg7[%c0_6, %c0_7], %7 {strides = array<i32>} : memref<8x128xf32, #tpu.memory_space<vmem>>, vector<8x128xf32>,
    %c0_i32_8 = arith.constant 0 : i32
    %9 = arith.cmpi eq, %arg2, %c0_i32_8 : i32
    %10 = arith.extui %9 : i1 to i32
    %c0_i32_9 = arith.constant 0 : i32
    %11 = arith.cmpi ne, %10, %c0_i32_9 : i32
    scf.if %11 {
      %c0_10 = arith.constant 0 : index
      %c0_11 = arith.constant 0 : index
      %12 = vector.load %arg7[%c0_10, %c0_11] : memref<8x128xf32, #tpu.memory_space<vmem>>, vector<8x128xf32>
      %c0_12 = arith.constant 0 : index
      %c0_13 = arith.constant 0 : index
      %13 = vector.load %arg5[%c0_12, %c0_13] : memref<1x128xf32, #tpu.memory_space<vmem>>, vector<1x128xf32>
      %14 = vector.broadcast %13 : vector<1x128xf32> to vector<8x128xf32>
      %15 = arith.addf %12, %14 : vector<8x128xf32>
      %c0_14 = arith.constant 0 : index
      %c0_15 = arith.constant 0 : index
      %16 = vector.load %arg6[%c0_14, %c0_15] : memref<8x128xf32, #tpu.memory_space<vmem>>, vector<8x128xf32>
      tpu.vector_store %arg6[%c0_14, %c0_15], %15 {strides = array<i32>} : memref<8x128xf32, #tpu.memory_space<vmem>>, vector<8x128xf32>,
    } else {
    }
    return
  }
  func.func @transform_0(%arg0: i32, %arg1: i32, %arg2: i32) -> (i32, i32) {
    %c0_i32 = arith.constant 0 : i32
    return %arg0, %arg2 : i32, i32
  }
  func.func @transform_1(%arg0: i32, %arg1: i32, %arg2: i32) -> (i32, i32) {
    %c0_i32 = arith.constant 0 : i32
    return %arg2, %arg1 : i32, i32
  }
  func.func @transform_2(%arg0: i32, %arg1: i32, %arg2: i32) -> (i32, i32) {
    %c0_i32 = arith.constant 0 : i32
    %c0_i32_0 = arith.constant 0 : i32
    return %c0_i32, %arg1 : i32, i32
  }
  func.func @transform_3(%arg0: i32, %arg1: i32, %arg2: i32) -> (i32, i32) {
    %c0_i32 = arith.constant 0 : i32
    return %arg0, %arg1 : i32, i32
  }
}

</mosaic_0001>

<bundles_post_ra>
// kernel: linear_forward.1
= control target key start
LH: loop header
LB: loop body
LE: loop exit
PB: predicated region body
PF: predicated region fallthrough
CT: control target
= control target key end

     0   :  { %v242_v3 = vmov 0.0|0.0   ;;  %vm243_vm0 = vmmov 0   ;;  %v244_v6 = vmov 0.0   ;;  %s332_s0 = inlined_call_operand.vmem [shape: f32[8,128], index: 0, kind: input, shape index: {}]   ;;  %s333_s1 = inlined_call_operand.vmem [shape: f32[128,128], index: 1, kind: input, shape index: {}]   ;;  %s334_s2 = inlined_call_operand.vmem [shape: f32[1,128], index: 2, kind: input, shape index: {}]   ;;  %s335_s3 = inlined_call_operand.hbm [shape: f32[8,128], index: 3, kind: output, shape index: {}]  }
   0x1   :  { %v22_v0 = vld [vmem:[%s333_s1] sm:$0xff]  ;;  %v23_v1 = vld [vmem:[%s333_s1 + $0x8] sm:$0xff]  ;;  %v24_v2 = vld [vmem:[%s333_s1 + $0x10] sm:$0xff]  ;;  %190 = vmatprep.subr.bf16.mxu0 %v242_v3  ;;  %187 = vmatprep.mubr.msk.f32.mxu0 %vm243_vm0, %v244_v6 }
   0x2   :  { %v191_v4 = vpack.c.bf16 %v23_v1, %v22_v0  ;;  %v25_v5 = vld [vmem:[%s333_s1 + $0x18] sm:$0xff]  ;;  %v26_v8 = vld [vmem:[%s333_s1 + $0x20] sm:$0xff]  ;;  %v27_v9 = vld [vmem:[%s333_s1 + $0x28] sm:$0xff] }
   0x3   :  { %v194_v7 = vpack.c.bf16 %v25_v5, %v24_v2 }
   0x4   :  { %192 = vmatpush3.bf16.msra.mxu0 %v191_v4 }
   0x5   :  { %193 = vmatprep.subr.bf16.mxu0 %v242_v3 }
   0x6   :  { %8 = vsyncpa [#allocation4], 0  ;;  %v197_v10 = vpack.c.bf16 %v27_v9, %v26_v8  ;;  %v28_v11 = vld [vmem:[%s333_s1 + $0x30] sm:$0xff]  ;;  %v29_v12 = vld [vmem:[%s333_s1 + $0x38] sm:$0xff]  ;;  %s245_s21 = smov [#allocation3]  }
   0x7   :  { %v200_v13 = vpack.c.bf16 %v29_v12, %v28_v11  ;;  %v30_v14 = vld [vmem:[%s333_s1 + $0x40] sm:$0xff]  ;;  %v31_v15 = vld [vmem:[%s333_s1 + $0x48] sm:$0xff]  ;;  %v32_v17 = vld [vmem:[%s333_s1 + $0x50] sm:$0xff]  ;;  %s129_s22 = sshll.u32 %s245_s21, 4  ;;  %s130_s22 = int_to_ptr.vmem [resolvable:$true] %s129_s22 }
   0x8   :  { %195 = vmatpush3.bf16.msra.mxu0 %v194_v7  ;;  %v203_v16 = vpack.c.bf16 %v31_v15, %v30_v14  ;;  %v33_v18 = vld [vmem:[%s333_s1 + $0x58] sm:$0xff]  ;;  %v34_v20 = vld [vmem:[%s333_s1 + $0x60] sm:$0xff]  ;;  %v35_v21 = vld [vmem:[%s333_s1 + $0x68] sm:$0xff]  ;;  %p223_p1 = scmp.lt.s32.totalorder %s130_s22, %s130_s22 }
   0x9   :  { %196 = vmatprep.subr.bf16.mxu0 %v242_v3  ;;  %v206_v19 = vpack.c.bf16 %v33_v18, %v32_v17  ;;  %v209_v22 = vpack.c.bf16 %v35_v21, %v34_v20  ;;  %v36_v23 = vld [vmem:[%s333_s1 + $0x70] sm:$0xff]  ;;  %v37_v24 = vld [vmem:[%s333_s1 + $0x78] sm:$0xff]  ;;  %v21_v26 = vld [vmem:[%s332_s0] sm:$0xff]  ;;  %s218_s1 = scalar_lea.vmem %s130_s22, 128 }
   0xa   :  { %v212_v25 = vpack.c.bf16 %v37_v24, %v36_v23  ;;  %v137_v27 = vld [vmem:[%s334_s2] ss:$0 sm:$0xff]  ;;  %p219_p0 = scmp.ne.s32.totalorder %s130_s22, %s218_s1  ;;  %p224_p2 = scmp.lt.s32.totalorder %s218_s1, %s218_s1 }
   0xc   :  { %198 = vmatpush3.bf16.msra.mxu0 %v197_v10  ;;  %p225_p3 = por %p224_p2, %p223_p1 }
   0xd   :  { %199 = vmatprep.subr.bf16.mxu0 %v242_v3 }
   0xe   :  { %p226_p4 = pnand %p225_p3, %p219_p0 }
  0x10   :  { %201 = vmatpush3.bf16.msra.mxu0 %v200_v13 }
  0x11   :  { %202 = vmatprep.subr.bf16.mxu0 %v242_v3 }
  0x14   :  { %204 = vmatpush3.bf16.msra.mxu0 %v203_v16 }
  0x15   :  { %205 = vmatprep.subr.bf16.mxu0 %v242_v3 }
  0x18   :  { %207 = vmatpush3.bf16.msra.mxu0 %v206_v19 }
  0x19   :  { %208 = vmatprep.subr.bf16.mxu0 %v242_v3 }
  0x1c   :  { %210 = vmatpush3.bf16.msra.mxu0 %v209_v22 }
  0x1d   :  { %211 = vmatprep.subr.bf16.mxu0 %v242_v3 }
  0x20   :  { %213 = vmatpush3.bf16.msra.mxu0 %v212_v25 }
  0x23   :  { %188 = vmatmul.mubr.f32.vlgmr.msra.gmra.mrb[0].mxu0 %v21_v26 }
  0xf6   :  { %v104_v28 = vpop.f32.mrb[0].mxu0 }
  0xf7   :  { %v121_v29 = vadd.f32 %v137_v27, %v104_v28  ;;  %v189_v30 = vpop.f32.mrb[1].mxu0 }
  0xf9   :  { %122 = vst [vmem:[#allocation3] sm:$0xff] %v121_v29 }
  0xfa   :  { %229 = shalt.err (!%p226_p4)
}
  0xfb   :  { %s230_s24 = scalar_lea.hbm %s335_s3, 128 }
  0xfc   :  { %p231_p5 = scmp.ne.s32.totalorder %s335_s3, %s230_s24  ;;  %p234_p6 = scmp.lt.u32.totalorder %s230_s24, %s335_s3 }
  0xfe   :  { %p236_p7 = pnand %p234_p6, %p231_p5 }
 0x100   :  { %239 = shalt.err (!%p236_p7)
}
 0x101   :  { %132 = dma.vmem_to_hbm [thread:$0]  %s130_s22, 128, %s335_s3, [#allocation4]  }
 0x102   :  { %240 = dma.done.wait [#allocation4], 128  }
 0x103   :  { %241 = vsyncadd [#allocation4], 4294967168 }
 0x104   :  { %136 = vsyncpa [#allocation4], 1 }

</bundles_post_ra>
